<compile_context>
chip_gen: v6e
topology: v6e:2x2x1
jax: 0.10.0
libtpu: 0.0.40
codegen_flags: <defaults>
</compile_context>

<pallas_src>
import functools

import jax
import jax.numpy as jnp
from jax.experimental import pallas as pl
from jax.experimental.pallas import tpu as pltpu


def gen_wass_loss_kernel(z_ref, w1_ref, b1_ref, w2_ref, b2_ref,
                         wf_ref, bf_ref, wd_ref, bd_ref, loss_ref,
                         h_scr, f_acc):
    """Fused generator -> extractor -> discriminator -> -mean() kernel.

    Grid axis = chunks of the flattened data dimension D.  Per step:
      x_chunk = tanh(h @ w2[:, chunk] + b2[chunk])          (bf16 x bf16 MXU)
      f_acc  += x_chunk @ wf[chunk, :]                      (bf16 x bf16 MXU)
    Epilogue (last step): ReLU, batch-sum, lane-dense dot with the pre-scaled
    discriminator weight, add (pre-negated) bias, store (1,1) SMEM scalar.
    """
    k = pl.program_id(0)
    nk = pl.num_programs(0)

    @pl.when(k == 0)
    def _():
        # Generator layer 1 (tiny: B x L x H). Computed once, kept resident in
        # VMEM scratch across the D-chunk grid.
        h = jnp.dot(z_ref[...], w1_ref[...],
                    preferred_element_type=jnp.float32) + b1_ref[...]
        h_scr[...] = jnp.maximum(h, 0.0)
        f_acc[...] = jnp.zeros_like(f_acc)

    # Generator layer 2 for this D-chunk: cast the (B,H) activation down to
    # bf16 and feed bf16 x bf16 to the MXU (f32 accumulation). No f32 copy of
    # the big weight is ever materialized.
    x_chunk = jnp.tanh(
        jnp.dot(h_scr[...].astype(jnp.bfloat16), w2_ref[...],
                preferred_element_type=jnp.float32) + b2_ref[...])    # (B, TD)

    # Feature-extractor partial contraction over this D-chunk (K-accumulate).
    f_acc[...] += jnp.dot(x_chunk.astype(jnp.bfloat16), wf_ref[...],
                          preferred_element_type=jnp.float32)          # (B, F)

    @pl.when(k == nk - 1)
    def _():
        f = jnp.maximum(f_acc[...] + bf_ref[...], 0.0)                 # (B, F)
        # Discriminator is linear, so the batch mean commutes with it and the
        # -1/B (and -bd) factors are folded into wd_ref/bd_ref on the host:
        #   -mean_b(f_b @ wd^T + bd) == sum_b(f_b) . (-wd/B) + (-bd)
        # wd_ref is lane-dense (1, F): VPU multiply + lane reduce, no MXU pop.
        colsum = jnp.sum(f, axis=0, keepdims=True)                     # (1, F)
        loss_ref[0, 0] = jnp.sum(colsum * wd_ref[...]) + bd_ref[0, 0]


@functools.partial(jax.jit, static_argnames=("d_chunk",))
def gen_wasserstein_loss(z, params, *, d_chunk=512):
    (w1, b1, w2, b2, wf, bf, wd, bd) = params
    B, L = z.shape
    H = w1.shape[1]
    D = w2.shape[1]
    F = wf.shape[1]
    assert D % d_chunk == 0, (D, d_chunk)
    n_chunks = D // d_chunk

    # One-time host-side parameter prep: fold the Wasserstein -mean() through
    # the linear discriminator (exact).
    wd_fold = wd * (-1.0 / B)          # (1, F) lane-dense, pre-scaled
    bd_fold = -bd                      # (1, 1) -> SMEM scalar

    operands = (z, w1, b1, w2, b2, wf, bf, wd_fold, bd_fold)
    bytes_accessed = sum(int(a.size) * a.dtype.itemsize for a in operands) + 4
    cost = pl.CostEstimate(
        flops=2 * (B * L * H + B * H * D + B * D * F + B * F),
        transcendentals=B * D,                 # tanh on the fake sample
        bytes_accessed=bytes_accessed,
    )

    grid_spec = pltpu.PrefetchScalarGridSpec(
        num_scalar_prefetch=0,
        grid=(n_chunks,),
        in_specs=[
            pl.BlockSpec((B, L), lambda k: (0, 0)),            # z       (once)
            pl.BlockSpec((L, H), lambda k: (0, 0)),            # w1      (once)
            pl.BlockSpec((1, H), lambda k: (0, 0)),            # b1      (once)
            pl.BlockSpec((H, d_chunk), lambda k: (0, k)),      # w2  bf16, N-chunked
            pl.BlockSpec((1, d_chunk), lambda k: (0, k)),      # b2        N-chunked
            pl.BlockSpec((d_chunk, F), lambda k: (k, 0)),      # wf  bf16, K-chunked
            pl.BlockSpec((1, F), lambda k: (0, 0)),            # bf      (once)
            pl.BlockSpec((1, F), lambda k: (0, 0)),            # wd fold (once)
            pl.BlockSpec((1, 1), lambda k: (0, 0),
                         memory_space=pltpu.MemorySpace.SMEM),  # bd fold (SMEM)
        ],
        out_specs=pl.BlockSpec((1, 1), lambda k: (0, 0),
                               memory_space=pltpu.MemorySpace.SMEM),
        scratch_shapes=[
            pltpu.VMEM((B, H), jnp.float32),   # resident generator hidden h
            pltpu.VMEM((B, F), jnp.float32),   # pre-ReLU feature accumulator
        ],
    )

    return pl.pallas_call(
        gen_wass_loss_kernel,
        out_shape=jax.ShapeDtypeStruct((1, 1), jnp.float32),
        grid_spec=grid_spec,
        compiler_params=pltpu.CompilerParams(
            dimension_semantics=("arbitrary",)),
        cost_estimate=cost,
    )(*operands)


def make_params(key, dim_latent, hidden, data_dim, feat_dim):
    """Deterministic synthetic parameters (Kaiming-ish scaling).

    The two large weights (w2, wf) are stored in bfloat16 — they account for
    ~95% of the bytes the (memory/launch-bound) kernel moves.  The
    discriminator weight is stored lane-dense as (1, feat_dim).
    """
    ks = jax.random.split(key, 4)
    w1 = jax.random.normal(ks[0], (dim_latent, hidden), jnp.float32) / jnp.sqrt(dim_latent)
    b1 = jnp.zeros((1, hidden), jnp.float32)
    w2 = (jax.random.normal(ks[1], (hidden, data_dim), jnp.float32)
          / jnp.sqrt(hidden)).astype(jnp.bfloat16)
    b2 = jnp.zeros((1, data_dim), jnp.float32)
    wf = (jax.random.normal(ks[2], (data_dim, feat_dim), jnp.float32)
          / jnp.sqrt(data_dim)).astype(jnp.bfloat16)
    bf = jnp.zeros((1, feat_dim), jnp.float32)
    wd = jax.random.normal(ks[3], (1, feat_dim), jnp.float32) / jnp.sqrt(feat_dim)
    bd = jnp.zeros((1, 1), jnp.float32)
    return (w1, b1, w2, b2, wf, bf, wd, bd)


def reference_loss(z, params):
    """Pure-JAX reference of the same forward (same bf16 weights/activations)."""
    (w1, b1, w2, b2, wf, bf, wd, bd) = params
    h = jnp.maximum(z @ w1 + b1, 0.0).astype(jnp.bfloat16)
    x_fake = jnp.tanh(jnp.dot(h, w2, preferred_element_type=jnp.float32) + b2)
    f = jnp.maximum(
        jnp.dot(x_fake.astype(jnp.bfloat16), wf,
                preferred_element_type=jnp.float32) + bf, 0.0)
    scores = f @ wd.T + bd                       # (B, 1) per-sample disc scores
    return -jnp.mean(scores)


if __name__ == "__main__":
    # data: NCHW, only the batch size matters for this loss.
    B, C, H, W = 8, 4, 16, 16
    data_dim = C * H * W                # 1024 (flattened fake-sample width)
    dim_latent = 32
    gen_hidden = 128
    feat_dim = 256

    key = jax.random.PRNGKey(0)
    k_data, k_latent, k_param = jax.random.split(key, 3)

    data = jax.random.normal(k_data, (B, C, H, W), jnp.float32)  # only len() used
    batch = data.shape[0]

    # self.model.generate(len(data)): latent samples (deterministic stand-in
    # for torch.randn inside generate()).
    z = jax.random.normal(k_latent, (batch, dim_latent), jnp.float32)

    params = make_params(k_param, dim_latent, gen_hidden, data_dim, feat_dim)

    loss = gen_wasserstein_loss(z, params)
    loss = jax.block_until_ready(loss)

    ref = reference_loss(z, params)
    # Kernel and reference use the same bf16 weights/activations; remaining
    # delta is f32 accumulation/reduction ordering (K-chunked wf contraction,
    # mean folded through the linear discriminator).
    assert jnp.allclose(loss[0, 0], ref, rtol=1e-3, atol=1e-3), (loss, ref)

    print("KERNEL_OK")
</pallas_src>

<mosaic_0001>
module attributes {stable_mosaic.version = 11 : i64} {
  func.func @gen_wass_loss_kernel(%arg0: i32, %arg1: memref<8x32xf32, #tpu.memory_space<vmem>>, %arg2: memref<32x128xf32, #tpu.memory_space<vmem>>, %arg3: memref<1x128xf32, #tpu.memory_space<vmem>>, %arg4: memref<128x512xbf16, #tpu.memory_space<vmem>>, %arg5: memref<1x512xf32, #tpu.memory_space<vmem>>, %arg6: memref<512x256xbf16, #tpu.memory_space<vmem>>, %arg7: memref<1x256xf32, #tpu.memory_space<vmem>>, %arg8: memref<1x256xf32, #tpu.memory_space<vmem>>, %arg9: memref<1x1xf32, #tpu.memory_space<smem>>, %arg10: memref<1x1xf32, #tpu.memory_space<smem>>, %arg11: memref<8x128xf32, #tpu.memory_space<vmem>>, %arg12: memref<8x256xf32, #tpu.memory_space<vmem>>) attributes {dimension_semantics = [#tpu.dimension_semantics<arbitrary>], iteration_bounds = array<i64: 2>, scalar_prefetch = 0 : i64, scratch_operands = 2 : i64, tpu.core_type = #tpu.core_type<tc>, window_params = [{pipeline_mode = #tpu.pipeline_mode<synchronous>, transform_indices = @transform_0, window_bounds = array<i64: 8, 32>}, {pipeline_mode = #tpu.pipeline_mode<synchronous>, transform_indices = @transform_1, window_bounds = array<i64: 32, 128>}, {pipeline_mode = #tpu.pipeline_mode<synchronous>, transform_indices = @transform_2, window_bounds = array<i64: 1, 128>}, {transform_indices = @transform_3, window_bounds = array<i64: 128, 512>}, {transform_indices = @transform_4, window_bounds = array<i64: 1, 512>}, {transform_indices = @transform_5, window_bounds = array<i64: 512, 256>}, {pipeline_mode = #tpu.pipeline_mode<synchronous>, transform_indices = @transform_6, window_bounds = array<i64: 1, 256>}, {pipeline_mode = #tpu.pipeline_mode<synchronous>, transform_indices = @transform_7, window_bounds = array<i64: 1, 256>}, {transform_indices = @transform_8, window_bounds = array<i64: 1, 1>}, {transform_indices = @transform_9, window_bounds = array<i64: 1, 1>}]} {
    %c0_i32 = arith.constant 0 : i32
    %0 = arith.cmpi eq, %arg0, %c0_i32 : i32
    %1 = arith.extui %0 : i1 to i32
    %c0_i32_0 = arith.constant 0 : i32
    %2 = arith.cmpi ne, %1, %c0_i32_0 : i32
    scf.if %2 {
      %c0_14 = arith.constant 0 : index
      %c0_15 = arith.constant 0 : index
      %20 = vector.load %arg1[%c0_14, %c0_15] : memref<8x32xf32, #tpu.memory_space<vmem>>, vector<8x32xf32>
      %c0_16 = arith.constant 0 : index
      %c0_17 = arith.constant 0 : index
      %21 = vector.load %arg2[%c0_16, %c0_17] : memref<32x128xf32, #tpu.memory_space<vmem>>, vector<32x128xf32>
      %cst_18 = arith.constant dense<0.000000e+00> : vector<8x128xf32>
      %22 = tpu.matmul %20, %21, %cst_18 {dimension_numbers = #tpu.dot_dimension_numbers<[1], [0], [0], [1], [0, 0, 1, 1], [], []>} : vector<8x32xf32>, vector<32x128xf32>, vector<8x128xf32> -> vector<8x128xf32>
      %c0_19 = arith.constant 0 : index
      %c0_20 = arith.constant 0 : index
      %23 = vector.load %arg3[%c0_19, %c0_20] : memref<1x128xf32, #tpu.memory_space<vmem>>, vector<1x128xf32>
      %24 = vector.broadcast %23 : vector<1x128xf32> to vector<8x128xf32>
      %25 = arith.addf %22, %24 : vector<8x128xf32>
      %cst_21 = arith.constant 0.000000e+00 : f32
      %26 = vector.broadcast %cst_21 : f32 to vector<8x128xf32>
      %27 = arith.maximumf %25, %26 : vector<8x128xf32>
      %c0_22 = arith.constant 0 : index
      %c0_23 = arith.constant 0 : index
      %28 = vector.load %arg11[%c0_22, %c0_23] : memref<8x128xf32, #tpu.memory_space<vmem>>, vector<8x128xf32>
      tpu.vector_store %arg11[%c0_22, %c0_23], %27 {strides = array<i32>} : memref<8x128xf32, #tpu.memory_space<vmem>>, vector<8x128xf32>,
      %cst_24 = arith.constant 0.000000e+00 : f32
      %29 = vector.broadcast %cst_24 : f32 to vector<8x256xf32>
      %c0_25 = arith.constant 0 : index
      %c0_26 = arith.constant 0 : index
      %30 = vector.load %arg12[%c0_25, %c0_26] : memref<8x256xf32, #tpu.memory_space<vmem>>, vector<8x256xf32>
      tpu.vector_store %arg12[%c0_25, %c0_26], %29 {strides = array<i32>} : memref<8x256xf32, #tpu.memory_space<vmem>>, vector<8x256xf32>,
    } else {
    }
    %c0 = arith.constant 0 : index
    %c0_1 = arith.constant 0 : index
    %3 = vector.load %arg11[%c0, %c0_1] : memref<8x128xf32, #tpu.memory_space<vmem>>, vector<8x128xf32>
    %4 = arith.truncf %3 : vector<8x128xf32> to vector<8x128xbf16>
    %c0_2 = arith.constant 0 : index
    %c0_3 = arith.constant 0 : index
    %5 = vector.load %arg4[%c0_2, %c0_3] : memref<128x512xbf16, #tpu.memory_space<vmem>>, vector<128x512xbf16>
    %cst = arith.constant dense<0.000000e+00> : vector<8x512xf32>
    %6 = tpu.matmul %4, %5, %cst {dimension_numbers = #tpu.dot_dimension_numbers<[1], [0], [0], [1], [0, 0, 1, 1], [], []>} : vector<8x128xbf16>, vector<128x512xbf16>, vector<8x512xf32> -> vector<8x512xf32>
    %c0_4 = arith.constant 0 : index
    %c0_5 = arith.constant 0 : index
    %7 = vector.load %arg5[%c0_4, %c0_5] : memref<1x512xf32, #tpu.memory_space<vmem>>, vector<1x512xf32>
    %8 = vector.broadcast %7 : vector<1x512xf32> to vector<8x512xf32>
    %9 = arith.addf %6, %8 : vector<8x512xf32>
    %10 = math.tanh %9 : vector<8x512xf32>
    %c0_6 = arith.constant 0 : index
    %c0_7 = arith.constant 0 : index
    %11 = vector.load %arg12[%c0_6, %c0_7] : memref<8x256xf32, #tpu.memory_space<vmem>>, vector<8x256xf32>
    %12 = arith.truncf %10 : vector<8x512xf32> to vector<8x512xbf16>
    %c0_8 = arith.constant 0 : index
    %c0_9 = arith.constant 0 : index
    %13 = vector.load %arg6[%c0_8, %c0_9] : memref<512x256xbf16, #tpu.memory_space<vmem>>, vector<512x256xbf16>
    %cst_10 = arith.constant dense<0.000000e+00> : vector<8x256xf32>
    %14 = tpu.matmul %12, %13, %cst_10 {dimension_numbers = #tpu.dot_dimension_numbers<[1], [0], [0], [1], [0, 0, 1, 1], [], []>} : vector<8x512xbf16>, vector<512x256xbf16>, vector<8x256xf32> -> vector<8x256xf32>
    %15 = arith.addf %11, %14 : vector<8x256xf32>
    %c0_11 = arith.constant 0 : index
    %c0_12 = arith.constant 0 : index
    %16 = vector.load %arg12[%c0_11, %c0_12] : memref<8x256xf32, #tpu.memory_space<vmem>>, vector<8x256xf32>
    tpu.vector_store %arg12[%c0_11, %c0_12], %15 {strides = array<i32>} : memref<8x256xf32, #tpu.memory_space<vmem>>, vector<8x256xf32>,
    %c1_i32 = arith.constant 1 : i32
    %17 = arith.cmpi eq, %arg0, %c1_i32 : i32
    %18 = arith.extui %17 : i1 to i32
    %c0_i32_13 = arith.constant 0 : i32
    %19 = arith.cmpi ne, %18, %c0_i32_13 : i32
    scf.if %19 {
      %c0_14 = arith.constant 0 : index
      %c0_15 = arith.constant 0 : index
      %20 = vector.load %arg12[%c0_14, %c0_15] : memref<8x256xf32, #tpu.memory_space<vmem>>, vector<8x256xf32>
      %c0_16 = arith.constant 0 : index
      %c0_17 = arith.constant 0 : index
      %21 = vector.load %arg7[%c0_16, %c0_17] : memref<1x256xf32, #tpu.memory_space<vmem>>, vector<1x256xf32>
      %22 = vector.broadcast %21 : vector<1x256xf32> to vector<8x256xf32>
      %23 = arith.addf %20, %22 : vector<8x256xf32>
      %cst_18 = arith.constant 0.000000e+00 : f32
      %24 = vector.broadcast %cst_18 : f32 to vector<8x256xf32>
      %25 = arith.maximumf %23, %24 : vector<8x256xf32>
      %cst_19 = arith.constant dense<0.000000e+00> : vector<256xf32>
      %26 = vector.multi_reduction <add>, %25, %cst_19 [0] : vector<8x256xf32> to vector<256xf32>
      %27 = vector.shape_cast %26 : vector<256xf32> to vector<1x256xf32>
      %c0_20 = arith.constant 0 : index
      %c0_21 = arith.constant 0 : index
      %28 = vector.load %arg8[%c0_20, %c0_21] : memref<1x256xf32, #tpu.memory_space<vmem>>, vector<1x256xf32>
      %29 = arith.mulf %27, %28 : vector<1x256xf32>
      %30 = vector.shape_cast %29 : vector<1x256xf32> to vector<1x1x256xf32>
      %cst_22 = arith.constant dense<0.000000e+00> : vector<1xf32>
      %31 = vector.multi_reduction <add>, %30, %cst_22 [1, 2] : vector<1x1x256xf32> to vector<1xf32>
      %32 = vector.shape_cast %31 : vector<1xf32> to vector<1x1x1xf32>
      %33 = vector.extract %32[0, 0, 0] : f32 from vector<1x1x1xf32>
      %c0_23 = arith.constant 0 : index
      %c0_24 = arith.constant 0 : index
      %34 = memref.load %arg9[%c0_23, %c0_24] : memref<1x1xf32, #tpu.memory_space<smem>>
      %35 = arith.addf %33, %34 : f32
      %c0_25 = arith.constant 0 : index
      %c0_26 = arith.constant 0 : index
      %36 = memref.load %arg10[%c0_25, %c0_26] : memref<1x1xf32, #tpu.memory_space<smem>>
      memref.store %35, %arg10[%c0_25, %c0_26] : memref<1x1xf32, #tpu.memory_space<smem>>
    } else {
    }
    return
  }
  func.func @transform_0(%arg0: i32) -> (i32, i32) {
    %c0_i32 = arith.constant 0 : i32
    %c0_i32_0 = arith.constant 0 : i32
    %c0_i32_1 = arith.constant 0 : i32
    return %c0_i32, %c0_i32_0 : i32, i32
  }
  func.func @transform_1(%arg0: i32) -> (i32, i32) {
    %c0_i32 = arith.constant 0 : i32
    %c0_i32_0 = arith.constant 0 : i32
    %c0_i32_1 = arith.constant 0 : i32
    return %c0_i32, %c0_i32_0 : i32, i32
  }
  func.func @transform_2(%arg0: i32) -> (i32, i32) {
    %c0_i32 = arith.constant 0 : i32
    %c0_i32_0 = arith.constant 0 : i32
    %c0_i32_1 = arith.constant 0 : i32
    return %c0_i32, %c0_i32_0 : i32, i32
  }
  func.func @transform_3(%arg0: i32) -> (i32, i32) {
    %c0_i32 = arith.constant 0 : i32
    %c0_i32_0 = arith.constant 0 : i32
    return %c0_i32, %arg0 : i32, i32
  }
  func.func @transform_4(%arg0: i32) -> (i32, i32) {
    %c0_i32 = arith.constant 0 : i32
    %c0_i32_0 = arith.constant 0 : i32
    return %c0_i32, %arg0 : i32, i32
  }
  func.func @transform_5(%arg0: i32) -> (i32, i32) {
    %c0_i32 = arith.constant 0 : i32
    %c0_i32_0 = arith.constant 0 : i32
    return %arg0, %c0_i32 : i32, i32
  }
  func.func @transform_6(%arg0: i32) -> (i32, i32) {
    %c0_i32 = arith.constant 0 : i32
    %c0_i32_0 = arith.constant 0 : i32
    %c0_i32_1 = arith.constant 0 : i32
    return %c0_i32, %c0_i32_0 : i32, i32
  }
  func.func @transform_7(%arg0: i32) -> (i32, i32) {
    %c0_i32 = arith.constant 0 : i32
    %c0_i32_0 = arith.constant 0 : i32
    %c0_i32_1 = arith.constant 0 : i32
    return %c0_i32, %c0_i32_0 : i32, i32
  }
  func.func @transform_8(%arg0: i32) -> (i32, i32) {
    %c0_i32 = arith.constant 0 : i32
    %c0_i32_0 = arith.constant 0 : i32
    %c0_i32_1 = arith.constant 0 : i32
    return %c0_i32, %c0_i32_0 : i32, i32
  }
  func.func @transform_9(%arg0: i32) -> (i32, i32) {
    %c0_i32 = arith.constant 0 : i32
    %c0_i32_0 = arith.constant 0 : i32
    %c0_i32_1 = arith.constant 0 : i32
    return %c0_i32, %c0_i32_0 : i32, i32
  }
}

</mosaic_0001>

<bundles_post_ra>
// kernel: gen_wasserstein_loss.1
= control target key start
LH: loop header
LB: loop body
LE: loop exit
PB: predicated region body
PF: predicated region fallthrough
CT: control target
= control target key end

     0   :  { %s2397_s0 = inlined_call_operand.hbm [shape: f32[8,32], index: 0, kind: input, shape index: {}]   ;;  %s2398_s1 = inlined_call_operand.hbm [shape: f32[32,128], index: 1, kind: input, shape index: {}]   ;;  %s2399_s2 = inlined_call_operand.vmem [shape: f32[1,128], index: 2, kind: input, shape index: {}]   ;;  %s2400_s3 = inlined_call_operand.hbm [shape: bf16[128,1024], index: 3, kind: input, shape index: {}]   ;;  %s2401_s4 = inlined_call_operand.vmem [shape: f32[1,1024], index: 4, kind: input, shape index: {}]   ;;  %s2402_s5 = inlined_call_operand.hbm [shape: bf16[1024,256], index: 5, kind: input, shape index: {}]   ;;  %s2403_s6 = inlined_call_operand.vmem [shape: f32[1,256], index: 6, kind: input, shape index: {}]   ;;  %s2404_s7 = inlined_call_operand.vmem [shape: f32[1,256], index: 7, kind: input, shape index: {}]   ;;  %s2405_s8 = inlined_call_operand.<no memory space> [shape: f32[1,1], index: 8, kind: input, shape index: {}]   ;;  %s2406_s9 = inlined_call_operand.hbm [shape: f32[1,1], index: 9, kind: output, shape index: {}]  }
   0x1   :  { %2412 = sst [smem:[#allocation17_spill]] %s2397_s0 }
   0x2   :  { %2413 = sst [smem:[#allocation18_spill]] %s2400_s3 }
   0x3   :  { %14 = sst [smem:[#allocation4]] %s2405_s8 }
   0x4   :  { %15 = vsyncpa [#allocation6], 0 }
   0x5   :  { %16 = vsyncpa [#allocation9], 0 }
   0x6   :  { %17 = vsyncpa [#allocation7], 0  ;;  %s2073_s11 = smov 0   ;;  %s2075_s12 = smov 0  }
   0x7   :  { %s2077_s13 = smov 0   ;;  %s2079_s14 = smov 0  }
   0x8 LB: > { %s2092_s8 = sadd.s32 4294967295, %s2005_s14   ;;  %s2095_s15 = sadd.s32 1, %s2005_s14   ;;  %s2005_s14 = sphi %s2079_s14, %s2433_s14   ;;  %s2001_s13 = sphi %s2077_s13, %s2432_s13   ;;  %s1997_s12 = sphi %s2075_s12, %s2431_s12   ;;  %s1993_s11 = sphi %s2073_s11, %s2430_s11  }
   0x9   : > { %s90_s16 = ssub.s32 %s2005_s14, %s2095_s15  ;;  %s93_s17 = sadd.s32 1, %s2001_s13 }
   0xa   : > { %p91_p0 = scmp.eq.s32.totalorder %s90_s16, 0  ;;  %p100_p1 = scmp.ne.s32.totalorder %s2001_s13, %s1997_s12 }
   0xb   : > { %p101_p2 = scmp.eq.s32.totalorder %s2005_s14, 0  ;;  %p106_p3 = scmp.ne.s32.totalorder %s1997_s12, %s1993_s11 }
   0xc   : > { %s2105_s18 = scalar_select %p91_p0, %s2001_s13, %s93_s17  }
   0xd   : > { %p2107_p4 = por %p101_p2, %p100_p1  ;;  %p2407_p5 = scmp.eq.s32.totalorder %s2092_s8, 0 }
   0xe   : > { %p1467_p6 = scmp.ge.s32.totalorder %s2005_s14, 1  ;;  %p253_p7 = scmp.lt.s32.totalorder %s2005_s14, 3 }
   0xf   : > { %p2116_p8 = por %p2407_p5, %p106_p3  ;;  %s2007_s22 = smov [#allocation5]  }
  0x10   : > { %p2121_p10 = pnand %p1467_p6, %p253_p7  ;;  %s266_s23 = sshll.u32 %s2007_s22, 4  ;;  %s267_s23 = int_to_ptr.vmem [resolvable:$true] %s266_s23 }
  0x11   : > { %s2415_s20 = scalar_select %p2116_p8, 1, 0 }
  0x12   : > { %s2416_s21 = scalar_select %p2121_p10, 1, 0 }
  0x13   : > { %p1625_p11 = pneg %p2121_p10  ;;  %p1641_p12 = scmp.lt.s32.totalorder %s2005_s14, 2 }
  0x14   : > { %s302_s24 = sand.u32 1, %s2005_s14   ;;  %s2408_s27 = sand.u32 1, %s2001_s13  }
  0x15   : > { %p2131_p13 = pnand %p1625_p11, %p2407_p5  ;;  %p2137_p0 = pnand %p1641_p12, %p2107_p4 }
  0x16   : > { %s1471_s28 = sshll.u32 %s2408_s27, 8  ;;  %s1852_s29 = scalar_lea.vmem %s267_s23, 128 }
  0x17   : > { %p2409_p1 = pneg %p2131_p13  ;;  %p1853_p2 = scmp.ne.s32.totalorder %s267_s23, %s1852_s29 }
  0x18   : > { %p1860_p7 = scmp.lt.s32.totalorder %s267_s23, %s267_s23  ;;  %p1861_p11 = scmp.lt.s32.totalorder %s1852_s29, %s1852_s29 }
  0x19   : > { %p1855_p3 = pnand %p1853_p2, %p2409_p1 }
  0x1a   : > { %p1862_p9 = por %p1861_p11, %p1860_p7 }
  0x1b   : > { %p1856_p6 = pneg %p1855_p3 }
  0x1d   : > { %p1863_p5 = pnand %p1862_p9, %p1856_p6 }
  0x1f   : > { %1866 = shalt.err (!%p1863_p5)
}
  0x20   : > { %s2419_s0 = sld [smem:[#allocation17_spill]]  ;;  %s1588_s11 = sshll.u32 %s2005_s14, 8 }
  0x21   : > { %s306_s16 = scalar_lea.vmem [#allocation10], %s1471_s28  ;;  %s2420_s3 = sld [smem:[#allocation18_spill]] }
  0x22   : > { %s313_s17 = sshll.u32 %s306_s16, 4  ;;  %s2162_s29 = scalar_lea.sflag [#allocation6], %s302_s24  ;;  %s2160_s17 = int_to_ptr.vmem [resolvable:$true] %s313_s17 }
  0x23   : > { %p1869_p5 = pneg %p2137_p0 }
  0x26   : > { %1628 = dma.hbm_to_vmem [thread:$0]  (!%p2131_p13), %s2419_s0, 128, %s267_s23, [#allocation6]  }
  0x27   : > { %s2158_s27 = scalar_lea.hbm %s2420_s3, %s1588_s11  ;;  %s1872_s10 = scalar_lea.hbm %s2420_s3, 8192 }
  0x28   : > { %s1867_s30 = scalar_lea.hbm %s2158_s27, 4096  ;;  %p1873_p2 = scmp.lt.s32.totalorder %s2158_s27, %s2420_s3 }
  0x29   : > { %p1868_p4 = scmp.ne.s32.totalorder %s2158_s27, %s1867_s30  ;;  %p1874_p3 = scmp.lt.s32.totalorder %s1872_s10, %s1867_s30 }
  0x2b   : > { %p1870_p9 = pnand %p1869_p5, %p1868_p4  ;;  %p1875_p6 = por %p1874_p3, %p1873_p2 }
  0x2d   : > { %p1871_p12 = pneg %p1870_p9 }
  0x2f   : > { %p1876_p7 = pnand %p1875_p6, %p1871_p12 }
  0x31   : > { %1879 = shalt.err (!%p1876_p7)
}
  0x32   : > { %s1880_s24 = scalar_lea.vmem %s2160_s17, 4096  ;;  %s2008_s19 = smov [#allocation10]  }
  0x33   : > { %p1881_p11 = scmp.ne.s32.totalorder %s2160_s17, %s1880_s24  ;;  %s1885_s22 = sshll.u32 %s2008_s19, 4  ;;  %s1886_s22 = int_to_ptr.vmem [resolvable:$false] %s1885_s22 }
  0x34   : > { %s1887_s23 = scalar_lea.vmem %s1886_s22, 8192  ;;  %p1888_p1 = scmp.lt.s32.totalorder %s2160_s17, %s1886_s22 }
  0x35   : > { %p1883_p4 = pnand %p1881_p11, %p1869_p5  ;;  %p1889_p8 = scmp.lt.s32.totalorder %s1887_s23, %s1880_s24 }
  0x37   : > { %p1884_p9 = pneg %p1883_p4  ;;  %p1890_p10 = por %p1889_p8, %p1888_p1 }
  0x39   : > { %p1891_p2 = pnand %p1890_p10, %p1884_p9 }
  0x3b   : > { %1894 = shalt.err (!%p1891_p2)
}
  0x3c   : > { %s2009_s30 = smov 512   ;;  %s2010_s28 = smov 256  }
  0x3d   : > { %s2011_s10 = smov 16   ;;  %s2012_s11 = smov [#allocation8]  }
  0x3e   : > { %1635 = dma.hbm_to_vmem [thread:$0]  (!%p2137_p0), %s2158_s27, 4096, %s2160_s17, %s2162_s29, %s2009_s30, %s2010_s28, %s2011_s10  }
  0x3f   : > { %s276_s16 = sshll.u32 %s2012_s11, 4  ;;  %p2421_p3 = pneg %p2131_p13  ;;  %s277_s16 = int_to_ptr.vmem [resolvable:$true] %s276_s16 }
  0x40   : > { %s1906_s19 = scalar_lea.vmem %s277_s16, 512  ;;  %p1914_p1 = scmp.lt.s32.totalorder %s277_s16, %s277_s16 }
  0x41   : > { %p1907_p12 = scmp.ne.s32.totalorder %s277_s16, %s1906_s19  ;;  %p1915_p6 = scmp.lt.s32.totalorder %s1906_s19, %s1906_s19 }
  0x43   : > { %p1909_p8 = pnand %p1907_p12, %p2421_p3  ;;  %p1916_p7 = por %p1915_p6, %p1914_p1 }
  0x45   : > { %p1910_p10 = pneg %p1909_p8 }
  0x47   : > { %p1917_p11 = pnand %p1916_p7, %p1910_p10 }
  0x49   : > { %1920 = shalt.err (!%p1917_p11)
}
  0x4a   : > { %s2013_s24 = smov 128   ;;  %s2014_s27 = smov 8  }
  0x4b   : > { %1631 = dma.hbm_to_vmem [thread:$0]  (!%p2131_p13), %s2398_s1, 512, %s277_s16, [#allocation9], %s2013_s24, %s2013_s24, %s2014_s27  }
  0x4c   : > { %s2422_s23 = sand.u32 1, %s2001_s13   ;;  %s1590_s28 = sshll.u32 %s2005_s14, 13 }
  0x4d   : > { %s1474_s30 = sshll.u32 %s2422_s23, 9  ;;  %s2206_s19 = scalar_lea.hbm %s2402_s5, %s1590_s28 }
  0x4e   : > { %s335_s0 = scalar_lea.vmem [#allocation11], %s1474_s30  ;;  %s1921_s3 = scalar_lea.hbm %s2206_s19, 8192 }
  0x4f   : > { %s343_s25 = sshll.u32 %s335_s0, 4  ;;  %p1922_p4 = scmp.ne.s32.totalorder %s2206_s19, %s1921_s3  ;;  %s344_s25 = int_to_ptr.vmem [resolvable:$true] %s343_s25 }
  0x50   : > { %s1926_s14 = scalar_lea.hbm %s2402_s5, 16384  ;;  %p1927_p2 = scmp.lt.s32.totalorder %s2206_s19, %s2402_s5 }
  0x51   : > { %p1924_p9 = pnand %p1922_p4, %p1869_p5  ;;  %p1928_p12 = scmp.lt.s32.totalorder %s1926_s14, %s1921_s3 }
  0x53   : > { %p1925_p13 = pneg %p1924_p9  ;;  %p1929_p3 = por %p1928_p12, %p1927_p2 }
  0x55   : > { %p1930_p8 = pnand %p1929_p3, %p1925_p13 }
  0x57   : > { %1933 = shalt.err (!%p1930_p8)
}
  0x58   : > { %s1934_s0 = scalar_lea.vmem %s344_s25, 8192  ;;  %s2015_s30 = smov [#allocation11]  }
  0x59   : > { %p1935_p10 = scmp.ne.s32.totalorder %s344_s25, %s1934_s0  ;;  %s1939_s28 = sshll.u32 %s2015_s30, 4  ;;  %s1940_s28 = int_to_ptr.vmem [resolvable:$false] %s1939_s28 }
  0x5a   : > { %s1941_s10 = scalar_lea.vmem %s1940_s28, 16384  ;;  %p1942_p7 = scmp.lt.s32.totalorder %s344_s25, %s1940_s28 }
  0x5b   : > { %p1937_p1 = pnand %p1935_p10, %p1869_p5  ;;  %p1943_p11 = scmp.lt.s32.totalorder %s1941_s10, %s1934_s0 }
  0x5d   : > { %p1938_p6 = pneg %p1937_p1  ;;  %p1944_p4 = por %p1943_p11, %p1942_p7 }
  0x5f   : > { %p1945_p9 = pnand %p1944_p4, %p1938_p6 }
  0x61   : > { %1948 = shalt.err (!%p1945_p9)
}
  0x62   : > { %1638 = dma.hbm_to_vmem [thread:$0]  (!%p2137_p0), %s2206_s19, 8192, %s344_s25, %s2162_s29, %s2013_s24, %s2013_s24, %s2014_s27  }
  0x63   : > { %p2423_p5 = scmp.ne.s32.totalorder %s2416_s21, 0 }
  0x64   : > { %p2424_p13 = scmp.eq.s32.totalorder (!%p2423_p5), %s2092_s8, 0 }
  0x65   : > { %355 = sbr.rel (%p2423_p5) target bundleno = 1018 (0x3fa), region = 56 }
  0x6a   : > { %1976 = dma.done.wait (%p2424_p13), [#allocation6], 128   ;;  %p2425_p2 = pmov %p2424_p13 }
  0x6c   : > { %1978 = vsyncadd (%p2425_p2), [#allocation6], 4294967168  ;;  %p2426_p12 = pmov %p2425_p2 }
  0x6d   : > { %p2427_p3 = pmov %p2425_p2 }
  0x6e   : > { %1980 = dma.done.wait (%p2426_p12), [#allocation9], 512  }
  0x6f   : > { %1982 = vsyncadd (%p2427_p3), [#allocation9], 4294966784  ;;  %s365_s3 = sand.u32 1, %s2092_s8   ;;  %s367_s26 = sand.u32 1, %s1997_s12  }
  0x70   : > { %s1481_s29 = sshll.u32 %s367_s26, 8  ;;  %s366_s21 = scalar_lea.sflag [#allocation6], %s365_s3 }
  0x71   : > { %s2242_s24 = scalar_lea.vmem [#allocation10], %s1481_s29  ;;  %p2428_p0 = scmp.ne.s32.totalorder %s2415_s20, 0 }
  0x73   : > { %1984 = dma.done.wait (%p2428_p0), %s366_s21, 12288  }
  0x74   : > { %1986 = vsyncadd (%p2428_p0), %s366_s21, 4294955008  ;;  %s1482_s27 = sshll.u32 %s367_s26, 9  ;;  %s1483_s11 = sshll.u32 %s2092_s8, 2 }
  0x75   : > { %p419_p8 = scmp.lt.s32.totalorder %s1483_s11, 7  ;;  %s2255_s17 = scalar_lea.vmem [#allocation11], %s1482_s27 }
  0x76   : > { %p2429_p10 = scmp.ne.s32.totalorder %s2092_s8, 0 }
  0x77   : > { %s2435_s11 = smov (!%p419_p8, %s1483_s11), 7 }
  0x78   : > { %s421_s16 = scalar_lea.vmem %s2401_s4, %s2435_s11  ;;  %428 = sbr.rel (%p2429_p10) target bundleno = 332 (0x14c), region = 76 }
  0x7d   : > { %v433_v0 = vld [vmem:[#allocation8 + $0x18] sm:$0xff]  ;;  %v2016_v1 = vmov 0.0   ;;  %v432_v2 = vld [vmem:[#allocation8 + $0x10] sm:$0xff]  ;;  %vm2017_vm0 = vmmov 0   ;;  %v431_v3 = vld [vmem:[#allocation8 + $0x8] sm:$0xff]  ;;  %vm441_vm1 = vcmask 261120  }
  0x7e   : > { %1596 = vmatprep.subr.mxu0 %v2016_v1  ;;  %517 = vst [vmem:[#allocation3] sm:$0xff] %v2016_v1  ;;  %518 = vst [vmem:[#allocation3 + $0x8] sm:$0xff] %v2016_v1  ;;  %1604 = vmatprep.mubr.msk.f32.mxu0 %vm2017_vm0, %v2016_v1  ;;  %v430_v4 = vld [vmem:[#allocation8] sm:$0xff]  ;;  %v429_v5 = vld [vmem:[#allocation5] sm:$0xff] }
  0x7f   : > { %1597 = vmatpush3.msra.mxu0 %v433_v0  ;;  %v1485_v6 = vld [vmem:[%s2399_s2] ss:$0 sm:$0xff] }
  0x80   : > { %1598 = vmatprep.subr.mxu0 %v2016_v1 }
  0x81   : > { %1599 = vmatpush3.msra.mxu0 %v432_v2 }
  0x82   : > { %1600 = vmatprep.subr.mxu0 %v2016_v1 }
  0x83   : > { %1601 = vmatpush3.msra.mxu0 %v431_v3 }
  0x84   : > { %1602 = vmatprep.subr.mxu0 %v2016_v1 }
  0x85   : > { %1603 = vmatpush3.msra.mxu0 %v430_v4 }
  0x86   : > { %1605 = vmatmul.mubr.msk.f32.vlgmr.msra.gmra.mxu0 %vm441_vm1, %v429_v5 }
 0x146   : > { %v511_v7 = vpop.f32.mrf.mxu0 }
 0x147   : > { %v512_v8 = vadd.f32 %v1485_v6, %v511_v7 }
 0x148   : > { %v1606_v9 = vpop.f32.mrf.mxu0 }
 0x149   : > { %v515_v10 = vmax.f32 %v512_v8, 0.0 }
 0x14b   : > { %516 = vst [vmem:[#allocation2] sm:$0xff] %v515_v10 }
 0x14c PF: > { %v1689_v11 = vld [vmem:[%s2242_s24 + $0xe4] ss:$16 sps:$4 sm:$0xff]   ;;  %v1691_v12 = vld [vmem:[%s2242_s24 + $0xec] ss:$16 sps:$4 sm:$0xff]   ;;  %v2018_v13 = vmov 0   ;;  %p1583_p1 = scmp.ne.s32.totalorder %s2092_s8, 1 }
 0x14d   : > { %767 = vmatprep.mubr.bf16.mxu0 %v2018_v13  ;;  %808 = vmatprep.mubr.bf16.mxu1 %v2018_v13  ;;  %v1693_v14 = vld [vmem:[%s2242_s24 + $0xe0] ss:$16 sps:$4 sm:$0xff]   ;;  %v1694_v15 = vld [vmem:[%s2242_s24 + $0xe8] ss:$16 sps:$4 sm:$0xff]   ;;  %v1695_v16 = vld [vmem:[%s2242_s24 + $0xc4] ss:$16 sps:$4 sm:$0xff]  }
 0x14e   : > { %735 = vmatprep.subr.bf16.mxu0 %v1689_v11  ;;  %776 = vmatprep.subr.bf16.mxu1 %v1691_v12  ;;  %v1697_v17 = vld [vmem:[%s2242_s24 + $0xcc] ss:$16 sps:$4 sm:$0xff]   ;;  %v1699_v18 = vld [vmem:[%s2242_s24 + $0xc0] ss:$16 sps:$4 sm:$0xff]   ;;  %v1700_v19 = vld [vmem:[%s2242_s24 + $0xc8] ss:$16 sps:$4 sm:$0xff]  }
 0x14f   : > { %736 = vmatpush1.bf16.msra.mxu0 %v1693_v14  ;;  %777 = vmatpush1.bf16.msra.mxu1 %v1694_v15  ;;  %v1701_v20 = vld [vmem:[%s2242_s24 + $0xa4] ss:$16 sps:$4 sm:$0xff]   ;;  %v1703_v21 = vld [vmem:[%s2242_s24 + $0xac] ss:$16 sps:$4 sm:$0xff]   ;;  %v1705_v22 = vld [vmem:[%s2242_s24 + $0xa0] ss:$16 sps:$4 sm:$0xff]  }
 0x150   : > { %737 = vmatprep.subr.bf16.mxu0 %v1695_v16  ;;  %778 = vmatprep.subr.bf16.mxu1 %v1697_v17  ;;  %v1706_v23 = vld [vmem:[%s2242_s24 + $0xa8] ss:$16 sps:$4 sm:$0xff]   ;;  %v1707_v24 = vld [vmem:[%s2242_s24 + $0x84] ss:$16 sps:$4 sm:$0xff]   ;;  %v1709_v25 = vld [vmem:[%s2242_s24 + $0x8c] ss:$16 sps:$4 sm:$0xff]  }
 0x151   : > { %v1711_v26 = vld [vmem:[%s2242_s24 + $0x80] ss:$16 sps:$4 sm:$0xff]   ;;  %v1712_v27 = vld [vmem:[%s2242_s24 + $0x88] ss:$16 sps:$4 sm:$0xff]   ;;  %v1713_v28 = vld [vmem:[%s2242_s24 + $0x64] ss:$16 sps:$4 sm:$0xff]  }
 0x152   : > { %v1715_v29 = vld [vmem:[%s2242_s24 + $0x6c] ss:$16 sps:$4 sm:$0xff]   ;;  %v1717_v30 = vld [vmem:[%s2242_s24 + $0x60] ss:$16 sps:$4 sm:$0xff]   ;;  %v1718_v31 = vld [vmem:[%s2242_s24 + $0x68] ss:$16 sps:$4 sm:$0xff]  }
 0x153   : > { %738 = vmatpush1.bf16.msra.mxu0 %v1699_v18  ;;  %779 = vmatpush1.bf16.msra.mxu1 %v1700_v19  ;;  %v1719_v32 = vld [vmem:[%s2242_s24 + $0x44] ss:$16 sps:$4 sm:$0xff]   ;;  %v1721_v33 = vld [vmem:[%s2242_s24 + $0x4c] ss:$16 sps:$4 sm:$0xff]   ;;  %v1723_v34 = vld [vmem:[%s2242_s24 + $0x40] ss:$16 sps:$4 sm:$0xff]  }
 0x154   : > { %739 = vmatprep.subr.bf16.mxu0 %v1701_v20  ;;  %780 = vmatprep.subr.bf16.mxu1 %v1703_v21  ;;  %v1724_v35 = vld [vmem:[%s2242_s24 + $0x48] ss:$16 sps:$4 sm:$0xff]   ;;  %v1725_v36 = vld [vmem:[%s2242_s24 + $0x24] ss:$16 sps:$4 sm:$0xff]   ;;  %v1727_v37 = vld [vmem:[%s2242_s24 + $0x2c] ss:$16 sps:$4 sm:$0xff]  }
 0x155   : > { %v1729_v38 = vld [vmem:[%s2242_s24 + $0x20] ss:$16 sps:$4 sm:$0xff]   ;;  %v1730_v39 = vld [vmem:[%s2242_s24 + $0x28] ss:$16 sps:$4 sm:$0xff]   ;;  %v1731_v40 = vld [vmem:[%s2242_s24 + $0x4] ss:$16 sps:$4 sm:$0xff]  }
 0x156   : > { %v1733_v41 = vld [vmem:[%s2242_s24 + $0xc] ss:$16 sps:$4 sm:$0xff]   ;;  %v1735_v42 = vld [vmem:[%s2242_s24] ss:$16 sps:$4 sm:$0xff]   ;;  %v1736_v43 = vld [vmem:[%s2242_s24 + $0x8] ss:$16 sps:$4 sm:$0xff]  }
 0x157   : > { %740 = vmatpush1.bf16.msra.mxu0 %v1705_v22  ;;  %781 = vmatpush1.bf16.msra.mxu1 %v1706_v23  ;;  %v519_v44 = vld [vmem:[#allocation2] sm:$0xff]  ;;  %v1739_v45 = vld [vmem:[%s2255_s17 + $0x74] ss:$8 sps:$4 sm:$0xff]   ;;  %v1737_v48 = vld [vmem:[%s2255_s17 + $0x70] ss:$8 sps:$4 sm:$0xff]   ;;  %s1358_s3 = sld [smem:[#allocation4]] (!%p1583_p1) }
 0x158   : > { %741 = vmatprep.subr.bf16.mxu0 %v1707_v24  ;;  %782 = vmatprep.subr.bf16.mxu1 %v1709_v25  ;;  %v1742_v46 = vld [vmem:[%s2255_s17 + $0x174] ss:$8 sps:$4 sm:$0xff]   ;;  %v520_v47 = vpack.c.bf16 %v519_v44, %v519_v44  ;;  %v1740_v49 = vld [vmem:[%s2255_s17 + $0x170] ss:$8 sps:$4 sm:$0xff]   ;;  %v1745_v50 = vld [vmem:[%s2255_s17 + $0x64] ss:$8 sps:$4 sm:$0xff]  }
 0x159   : > { %v1748_v51 = vld [vmem:[%s2255_s17 + $0x164] ss:$8 sps:$4 sm:$0xff]   ;;  %v1743_v52 = vld [vmem:[%s2255_s17 + $0x60] ss:$8 sps:$4 sm:$0xff]   ;;  %v1751_v54 = vld [vmem:[%s2255_s17 + $0x54] ss:$8 sps:$4 sm:$0xff]  }
 0x15a   : > { %v1746_v53 = vld [vmem:[%s2255_s17 + $0x160] ss:$8 sps:$4 sm:$0xff]   ;;  %v1754_v55 = vld [vmem:[%s2255_s17 + $0x154] ss:$8 sps:$4 sm:$0xff]   ;;  %v1749_v56 = vld [vmem:[%s2255_s17 + $0x50] ss:$8 sps:$4 sm:$0xff]  }
 0x15b   : > { %742 = vmatpush1.bf16.msra.mxu0 %v1711_v26  ;;  %783 = vmatpush1.bf16.msra.mxu1 %v1712_v27  ;;  %v1752_v57 = vld [vmem:[%s2255_s17 + $0x150] ss:$8 sps:$4 sm:$0xff]   ;;  %v1757_v58 = vld [vmem:[%s2255_s17 + $0x44] ss:$8 sps:$4 sm:$0xff]   ;;  %v1755_v60 = vld [vmem:[%s2255_s17 + $0x40] ss:$8 sps:$4 sm:$0xff]  }
 0x15c   : > { %743 = vmatprep.subr.bf16.mxu0 %v1713_v28  ;;  %784 = vmatprep.subr.bf16.mxu1 %v1715_v29  ;;  %v1760_v59 = vld [vmem:[%s2255_s17 + $0x144] ss:$8 sps:$4 sm:$0xff]   ;;  %v1758_v61 = vld [vmem:[%s2255_s17 + $0x140] ss:$8 sps:$4 sm:$0xff]   ;;  %v1763_v62 = vld [vmem:[%s2255_s17 + $0x34] ss:$8 sps:$4 sm:$0xff]  }
 0x15d   : > { %v1766_v63 = vld [vmem:[%s2255_s17 + $0x134] ss:$8 sps:$4 sm:$0xff]   ;;  %v1761_v0 = vld [vmem:[%s2255_s17 + $0x30] ss:$8 sps:$4 sm:$0xff]   ;;  %v1769_v2 = vld [vmem:[%s2255_s17 + $0x24] ss:$8 sps:$4 sm:$0xff]  }
 0x15e   : > { %v1764_v1 = vld [vmem:[%s2255_s17 + $0x130] ss:$8 sps:$4 sm:$0xff]   ;;  %v1772_v3 = vld [vmem:[%s2255_s17 + $0x124] ss:$8 sps:$4 sm:$0xff]   ;;  %v1767_v4 = vld [vmem:[%s2255_s17 + $0x20] ss:$8 sps:$4 sm:$0xff]  }
 0x15f   : > { %744 = vmatpush1.bf16.msra.mxu0 %v1717_v30  ;;  %785 = vmatpush1.bf16.msra.mxu1 %v1718_v31  ;;  %v1770_v5 = vld [vmem:[%s2255_s17 + $0x120] ss:$8 sps:$4 sm:$0xff]   ;;  %v1775_v6 = vld [vmem:[%s2255_s17 + $0x14] ss:$8 sps:$4 sm:$0xff]   ;;  %v1773_v8 = vld [vmem:[%s2255_s17 + $0x10] ss:$8 sps:$4 sm:$0xff]  }
 0x160   : > { %745 = vmatprep.subr.bf16.mxu0 %v1719_v32  ;;  %786 = vmatprep.subr.bf16.mxu1 %v1721_v33  ;;  %v1778_v7 = vld [vmem:[%s2255_s17 + $0x114] ss:$8 sps:$4 sm:$0xff]   ;;  %v1776_v9 = vld [vmem:[%s2255_s17 + $0x110] ss:$8 sps:$4 sm:$0xff]   ;;  %v1781_v10 = vld [vmem:[%s2255_s17 + $0x4] ss:$8 sps:$4 sm:$0xff]  }
 0x161   : > { %v1784_v11 = vld [vmem:[%s2255_s17 + $0x104] ss:$8 sps:$4 sm:$0xff]   ;;  %v1779_v12 = vld [vmem:[%s2255_s17] ss:$8 sps:$4 sm:$0xff]   ;;  %v1787_v14 = vld [vmem:[%s2255_s17 + $0xf4] ss:$8 sps:$4 sm:$0xff]  }
 0x162   : > { %v1782_v13 = vld [vmem:[%s2255_s17 + $0x100] ss:$8 sps:$4 sm:$0xff]   ;;  %v1790_v15 = vld [vmem:[%s2255_s17 + $0x1f4] ss:$8 sps:$4 sm:$0xff]   ;;  %v1785_v16 = vld [vmem:[%s2255_s17 + $0xf0] ss:$8 sps:$4 sm:$0xff]  }
 0x163   : > { %746 = vmatpush1.bf16.msra.mxu0 %v1723_v34  ;;  %787 = vmatpush1.bf16.msra.mxu1 %v1724_v35  ;;  %v1788_v17 = vld [vmem:[%s2255_s17 + $0x1f0] ss:$8 sps:$4 sm:$0xff]   ;;  %v1793_v18 = vld [vmem:[%s2255_s17 + $0xe4] ss:$8 sps:$4 sm:$0xff]   ;;  %v1791_v20 = vld [vmem:[%s2255_s17 + $0xe0] ss:$8 sps:$4 sm:$0xff]  }
 0x164   : > { %747 = vmatprep.subr.bf16.mxu0 %v1725_v36  ;;  %788 = vmatprep.subr.bf16.mxu1 %v1727_v37  ;;  %v1796_v19 = vld [vmem:[%s2255_s17 + $0x1e4] ss:$8 sps:$4 sm:$0xff]   ;;  %v1794_v21 = vld [vmem:[%s2255_s17 + $0x1e0] ss:$8 sps:$4 sm:$0xff]   ;;  %v1799_v22 = vld [vmem:[%s2255_s17 + $0xd4] ss:$8 sps:$4 sm:$0xff]  }
 0x165   : > { %v1802_v23 = vld [vmem:[%s2255_s17 + $0x1d4] ss:$8 sps:$4 sm:$0xff]   ;;  %v1797_v24 = vld [vmem:[%s2255_s17 + $0xd0] ss:$8 sps:$4 sm:$0xff]   ;;  %v1805_v26 = vld [vmem:[%s2255_s17 + $0xc4] ss:$8 sps:$4 sm:$0xff]  }
 0x166   : > { %v1800_v25 = vld [vmem:[%s2255_s17 + $0x1d0] ss:$8 sps:$4 sm:$0xff]   ;;  %v1808_v27 = vld [vmem:[%s2255_s17 + $0x1c4] ss:$8 sps:$4 sm:$0xff]   ;;  %v1803_v28 = vld [vmem:[%s2255_s17 + $0xc0] ss:$8 sps:$4 sm:$0xff]  }
 0x167   : > { %748 = vmatpush1.bf16.msra.mxu0 %v1729_v38  ;;  %789 = vmatpush1.bf16.msra.mxu1 %v1730_v39  ;;  %v1806_v29 = vld [vmem:[%s2255_s17 + $0x1c0] ss:$8 sps:$4 sm:$0xff]   ;;  %v1811_v30 = vld [vmem:[%s2255_s17 + $0xb4] ss:$8 sps:$4 sm:$0xff]   ;;  %v1809_v32 = vld [vmem:[%s2255_s17 + $0xb0] ss:$8 sps:$4 sm:$0xff]  }
 0x168   : > { %749 = vmatprep.subr.bf16.mxu0 %v1731_v40  ;;  %790 = vmatprep.subr.bf16.mxu1 %v1733_v41  ;;  %v1814_v31 = vld [vmem:[%s2255_s17 + $0x1b4] ss:$8 sps:$4 sm:$0xff]   ;;  %v1812_v33 = vld [vmem:[%s2255_s17 + $0x1b0] ss:$8 sps:$4 sm:$0xff]   ;;  %v1817_v34 = vld [vmem:[%s2255_s17 + $0xa4] ss:$8 sps:$4 sm:$0xff]  }
 0x169   : > { %v1820_v35 = vld [vmem:[%s2255_s17 + $0x1a4] ss:$8 sps:$4 sm:$0xff]   ;;  %v1815_v36 = vld [vmem:[%s2255_s17 + $0xa0] ss:$8 sps:$4 sm:$0xff]   ;;  %v1823_v38 = vld [vmem:[%s2255_s17 + $0x94] ss:$8 sps:$4 sm:$0xff]  }
 0x16a   : > { %v1818_v37 = vld [vmem:[%s2255_s17 + $0x1a0] ss:$8 sps:$4 sm:$0xff]   ;;  %v1826_v39 = vld [vmem:[%s2255_s17 + $0x194] ss:$8 sps:$4 sm:$0xff]   ;;  %v1821_v40 = vld [vmem:[%s2255_s17 + $0x90] ss:$8 sps:$4 sm:$0xff]  }
 0x16b   : > { %750 = vmatpush1.bf16.msra.mxu0 %v1735_v42  ;;  %791 = vmatpush1.bf16.msra.mxu1 %v1736_v43  ;;  %v1824_v41 = vld [vmem:[%s2255_s17 + $0x190] ss:$8 sps:$4 sm:$0xff]   ;;  %v1829_v42 = vld [vmem:[%s2255_s17 + $0x84] ss:$8 sps:$4 sm:$0xff]   ;;  %v1827_v44 = vld [vmem:[%s2255_s17 + $0x80] ss:$8 sps:$4 sm:$0xff]  }
 0x16c   : > { %1211 = vmatprep.subr.bf16.mxu0 %v1739_v45  ;;  %1252 = vmatprep.subr.bf16.mxu1 %v1742_v46  ;;  %v1832_v43 = vld [vmem:[%s2255_s17 + $0x184] ss:$8 sps:$4 sm:$0xff]   ;;  %v1830_v45 = vld [vmem:[%s2255_s17 + $0x180] ss:$8 sps:$4 sm:$0xff]   ;;  %v555_v46 = vlaneseq }
 0x16e   : > { %768 = vmatmul.mubr.bf16.vlgmr.msra.gmra.mxu0 %v520_v47  ;;  %809 = vmatmul.mubr.bf16.vlgmr.msra.gmra.mxu1 %v520_v47  ;;  %v556_v47 = vshrl.u32 %v555_v46, 7 }
 0x16f   : > { %1212 = vmatpush1.bf16.msra.mxu0 %v1737_v48  ;;  %1253 = vmatpush1.bf16.msra.mxu1 %v1740_v49 }
 0x170   : > { %1213 = vmatprep.subr.bf16.mxu0 %v1745_v50  ;;  %1254 = vmatprep.subr.bf16.mxu1 %v1748_v51  ;;  %v2358_v48 = vsub.s32 0, %v556_v47  ;;  %v565_v49 = vsub.s32 2, %v556_v47  ;;  %v553_v50 = vld [vmem:[%s421_s16] sm:$0xf]  ;;  %v2365_v51 = vsub.s32 1, %v556_v47 }
 0x173   : > { %1214 = vmatpush1.bf16.msra.mxu0 %v1743_v52  ;;  %1255 = vmatpush1.bf16.msra.mxu1 %v1746_v53  ;;  %v569_v52 = vsub.s32 3, %v556_v47  ;;  %v558_v53 = vrot.slane %v553_v50, %v2358_v48 }
 0x174   : > { %1215 = vmatprep.subr.bf16.mxu0 %v1751_v54  ;;  %1256 = vmatprep.subr.bf16.mxu1 %v1754_v55  ;;  %v566_v54 = vrot.slane %v553_v50, %v565_v49  ;;  %v562_v55 = vrot.slane %v553_v50, %v2365_v51 }
 0x177   : > { %1216 = vmatpush1.bf16.msra.mxu0 %v1749_v56  ;;  %1257 = vmatpush1.bf16.msra.mxu1 %v1752_v57  ;;  %v570_v56 = vrot.slane %v553_v50, %v569_v52 }
 0x178   : > { %1217 = vmatprep.subr.bf16.mxu0 %v1757_v58  ;;  %1258 = vmatprep.subr.bf16.mxu1 %v1760_v59 }
 0x17b   : > { %1218 = vmatpush1.bf16.msra.mxu0 %v1755_v60  ;;  %1259 = vmatpush1.bf16.msra.mxu1 %v1758_v61 }
 0x17c   : > { %1219 = vmatprep.subr.bf16.mxu0 %v1763_v62  ;;  %1260 = vmatprep.subr.bf16.mxu1 %v1766_v63 }
 0x17f   : > { %1220 = vmatpush1.bf16.msra.mxu0 %v1761_v0  ;;  %1261 = vmatpush1.bf16.msra.mxu1 %v1764_v1 }
 0x180   : > { %1221 = vmatprep.subr.bf16.mxu0 %v1769_v2  ;;  %1262 = vmatprep.subr.bf16.mxu1 %v1772_v3 }
 0x183   : > { %1222 = vmatpush1.bf16.msra.mxu0 %v1767_v4  ;;  %1263 = vmatpush1.bf16.msra.mxu1 %v1770_v5 }
 0x184   : > { %1223 = vmatprep.subr.bf16.mxu0 %v1775_v6  ;;  %1264 = vmatprep.subr.bf16.mxu1 %v1778_v7 }
 0x187   : > { %1224 = vmatpush1.bf16.msra.mxu0 %v1773_v8  ;;  %1265 = vmatpush1.bf16.msra.mxu1 %v1776_v9 }
 0x188   : > { %1225 = vmatprep.subr.bf16.mxu0 %v1781_v10  ;;  %1266 = vmatprep.subr.bf16.mxu1 %v1784_v11 }
 0x18b   : > { %1226 = vmatpush1.bf16.msra.mxu0 %v1779_v12  ;;  %1267 = vmatpush1.bf16.msra.mxu1 %v1782_v13 }
 0x18c   : > { %1227 = vmatprep.subr.bf16.mxu0 %v1787_v14  ;;  %1268 = vmatprep.subr.bf16.mxu1 %v1790_v15  ;;  %v821_v14 = vld [vmem:[#allocation3] sm:$0xff] }
 0x18f   : > { %1228 = vmatpush2.bf16.msra.mxu0 %v1785_v16  ;;  %1269 = vmatpush2.bf16.msra.mxu1 %v1788_v17 }
 0x190   : > { %1229 = vmatprep.subr.bf16.mxu0 %v1793_v18  ;;  %1270 = vmatprep.subr.bf16.mxu1 %v1796_v19  ;;  %v822_v18 = vld [vmem:[#allocation3 + $0x8] sm:$0xff] }
 0x193   : > { %1230 = vmatpush2.bf16.msra.mxu0 %v1791_v20  ;;  %1271 = vmatpush2.bf16.msra.mxu1 %v1794_v21 }
 0x194   : > { %1231 = vmatprep.subr.bf16.mxu0 %v1799_v22  ;;  %1272 = vmatprep.subr.bf16.mxu1 %v1802_v23 }
 0x197   : > { %1232 = vmatpush2.bf16.msra.mxu0 %v1797_v24  ;;  %1273 = vmatpush2.bf16.msra.mxu1 %v1800_v25 }
 0x198   : > { %1233 = vmatprep.subr.bf16.mxu0 %v1805_v26  ;;  %1274 = vmatprep.subr.bf16.mxu1 %v1808_v27 }
 0x19b   : > { %1234 = vmatpush2.bf16.msra.mxu0 %v1803_v28  ;;  %1275 = vmatpush2.bf16.msra.mxu1 %v1806_v29 }
 0x19c   : > { %1235 = vmatprep.subr.bf16.mxu0 %v1811_v30  ;;  %1276 = vmatprep.subr.bf16.mxu1 %v1814_v31 }
 0x19f   : > { %1236 = vmatpush2.bf16.msra.mxu0 %v1809_v32  ;;  %1277 = vmatpush2.bf16.msra.mxu1 %v1812_v33 }
 0x1a0   : > { %1237 = vmatprep.subr.bf16.mxu0 %v1817_v34  ;;  %1278 = vmatprep.subr.bf16.mxu1 %v1820_v35 }
 0x1a3   : > { %1238 = vmatpush2.bf16.msra.mxu0 %v1815_v36  ;;  %1279 = vmatpush2.bf16.msra.mxu1 %v1818_v37 }
 0x1a4   : > { %1239 = vmatprep.subr.bf16.mxu0 %v1823_v38  ;;  %1280 = vmatprep.subr.bf16.mxu1 %v1826_v39 }
 0x1a7   : > { %1240 = vmatpush2.bf16.msra.mxu0 %v1821_v40  ;;  %1281 = vmatpush2.bf16.msra.mxu1 %v1824_v41 }
 0x1a8   : > { %1241 = vmatprep.subr.bf16.mxu0 %v1829_v42  ;;  %1282 = vmatprep.subr.bf16.mxu1 %v1832_v43 }
 0x1ab   : > { %1242 = vmatpush2.bf16.msra.mxu0 %v1827_v44  ;;  %1283 = vmatpush2.bf16.msra.mxu1 %v1830_v45 }
 0x22e   : > { %v769_v57 = vpop.f32.mrf.mxu0  ;;  %v810_v58 = vpop.f32.mrf.mxu1 }
 0x22f   : > { %v770_v59 = vadd.f32 %v769_v57, %v558_v53  ;;  %v811_v60 = vadd.f32 %v810_v58, %v566_v54 }
 0x230   : > { %v771_v61 = vpop.f32.mrf.mxu0  ;;  %v812_v62 = vpop.f32.mrf.mxu1 }
 0x231   : > { %1833 = vtanh.f32 %v770_v59  ;;  %v772_v63 = vadd.f32 %v771_v61, %v562_v55  ;;  %v813_v0 = vadd.f32 %v812_v62, %v570_v56 }
 0x232   : > { %1835 = vtanh.f32 %v811_v60  ;;  %v773_v1 = vpop.f32.mrf.mxu0  ;;  %v814_v2 = vpop.f32.mrf.mxu1 }
 0x233   : > { %1837 = vtanh.f32 %v772_v63 }
 0x234   : > { %1839 = vtanh.f32 %v813_v0  ;;  %v774_v3 = vpop.f32.mrf.mxu0  ;;  %v815_v4 = vpop.f32.mrf.mxu1 }
 0x23e   : > { %v1834_v5 = vpop.eup %1833 }
 0x23f   : > { %v1836_v6 = vpop.eup %1835  ;;  %v823_v10 = vpack.c.bf16 %v1834_v5, %v1834_v5 }
 0x240   : > { %v1838_v7 = vpop.eup %1837  ;;  %v825_v12 = vpack.c.bf16 %v1836_v6, %v1836_v6 }
 0x241   : > { %v1840_v8 = vpop.eup %1839  ;;  %v824_v9 = vpack.c.bf16 %v1838_v7, %v1838_v7 }
 0x242   : > { %v826_v11 = vpack.c.bf16 %v1840_v8, %v1840_v8 }
 0x243   : > { %1243 = vmatprep.mubr.bf16.mxu0 %v824_v9 }
 0x244   : > { %1284 = vmatprep.mubr.bf16.mxu1 %v826_v11  ;;  %1244 = vmatmul.mubr.bf16.vlgmr.msra.gmra.mxu0 %v823_v10 }
 0x245   : > { %1285 = vmatmul.mubr.bf16.vlgmr.msra.gmra.mxu1 %v825_v12 }
 0x304   : > { %v1245_v13 = vpop.f32.mrf.mxu0 }
 0x305   : > { %v1286_v15 = vpop.f32.mrf.mxu1 }
 0x306   : > { %v1287_v16 = vadd.f32 %v1286_v15, %v1245_v13  ;;  %v1247_v17 = vpop.f32.mrf.mxu0 }
 0x307   : > { %v1288_v19 = vpop.f32.mrf.mxu1 }
 0x308   : > { %v1293_v20 = vadd.f32 %v1287_v16, %v821_v14  ;;  %v1289_v21 = vadd.f32 %v1288_v19, %v1247_v17  ;;  %v1249_v22 = vpop.f32.mrf.mxu0  ;;  %1300 = sbr.rel (%p1583_p1) target bundleno = 1012 (0x3f4), region = 80 }
 0x309   : > { %v1290_v23 = vpop.f32.mrf.mxu1 }
 0x30a   : > { %1295 = vst [vmem:[#allocation3] sm:$0xff] %v1293_v20  ;;  %v1294_v24 = vadd.f32 %v1289_v21, %v822_v18  ;;  %v1250_v25 = vpop.f32.mrf.mxu0 }
 0x30b   : > { %v1291_v26 = vpop.f32.mrf.mxu1 }
 0x30c   : > { %1296 = vst [vmem:[#allocation3 + $0x8] sm:$0xff] %v1294_v24 }
 0x30d   : > { %v1303_v29 = vld [vmem:[%s2403_s6] sm:$0x3]  ;;  %vm1345_vm2 = vcmask 1040384  }
 0x30e   : > { %v1308_v30 = vrot.slane %v1303_v29, %v2358_v48  ;;  %v1312_v31 = vrot.slane %v1303_v29, %v2365_v51  ;;  %v1331_v42 = vld [vmem:[%s2404_s7] sm:$0x3] }
 0x30f   : > { %v1336_v47 = vrot.slane %v1331_v42, %v2358_v48  ;;  %v1340_v49 = vrot.slane %v1331_v42, %v2365_v51 }
 0x311   : > { %v1301_v27 = vld [vmem:[#allocation3] sm:$0xff] }
 0x312   : > { %v1315_v32 = vadd.f32 %v1308_v30, %v1301_v27 }
 0x313   : > { %v1302_v28 = vld [vmem:[#allocation3 + $0x8] sm:$0xff] }
 0x314   : > { %v1316_v33 = vadd.f32 %v1312_v31, %v1302_v28  ;;  %v1317_v34 = vmax.f32 %v1315_v32, 0.0 }
 0x316   : > { %v1318_v35 = vmax.f32 %v1316_v33, 0.0  ;;  %v1319_v36 = vrot.slane %v1317_v34, 4 }
 0x318   : > { %v1325_v37 = vrot.slane %v1318_v35, 4  ;;  %v1320_v38 = vadd.f32 %v1319_v36, %v1317_v34 }
 0x31a   : > { %v1326_v39 = vadd.f32 %v1325_v37, %v1318_v35  ;;  %v1321_v40 = vrot.slane %v1320_v38, 2 }
 0x31c   : > { %v1327_v41 = vrot.slane %v1326_v39, 2  ;;  %v1322_v43 = vadd.f32 %v1321_v40, %v1320_v38 }
 0x31e   : > { %v1328_v44 = vadd.f32 %v1327_v41, %v1326_v39  ;;  %v1323_v45 = vrot.slane %v1322_v43, 1 }
 0x320   : > { %v1329_v46 = vrot.slane %v1328_v44, 1  ;;  %v1324_v50 = vadd.f32 %v1323_v45, %v1322_v43 }
 0x322   : > { %v1330_v52 = vadd.f32 %v1329_v46, %v1328_v44  ;;  %v1343_v53 = vmul.f32 %v1336_v47, %v1324_v50 }
 0x324   : > { %v1344_v54 = vmul.f32 %v1340_v49, %v1330_v52  ;;  %v1346_v55 = vsel %vm1345_vm2, %v1343_v53, 0.0 }
 0x326   : > { %v1347_v56 = vsel %vm1345_vm2, %v1344_v54, 0.0 }
 0x327   : > { %v1348_v57 = vadd.f32 %v1347_v56, %v1346_v55 }
 0x329   : > { %1349 = vadd.xlane.f32.xlu0 %v1348_v57 }
 0x3b2   : > { %v1350_v58 = vpop.xlane.xlu0 %1349 }
 0x3b3   : > { %v1351_v59 = vrot.slane %v1350_v58, 4 }
 0x3b5   : > { %v1352_v60 = vadd.f32 %v1351_v59, %v1350_v58 }
 0x3b7   : > { %v1353_v61 = vrot.slane %v1352_v60, 2 }
 0x3b9   : > { %v1354_v62 = vadd.f32 %v1353_v61, %v1352_v60 }
 0x3bb   : > { %v1355_v63 = vrot.slane %v1354_v62, 1 }
 0x3bd   : > { %v1356_v0 = vadd.f32 %v1355_v63, %v1354_v62 }
 0x3bf   : > { %1607 = vpush %v1356_v0 }
 0x3f0   : > { %s1608_s26 = spop %1607 }
 0x3f1   : > { %s1359_s29 = sadd.f32 %s1608_s26, %s1358_s3 }
 0x3f3   : > { %1361 = sst [smem:[#allocation12]] %s1359_s29 }
 0x3f4 PF: > { %p1644_p6 = scmp.eq.s32.totalorder %s2092_s8, 1  ;;  %s2019_s21 = smov [#allocation12]  }
 0x3f6   : > { %1622 = dma.smem_to_hbm (%p1644_p6), %s2019_s21, 16, %s2406_s9, [#allocation7]  }
 0x3f7   : > { %1988 = dma.done.wait (%p1644_p6), [#allocation7], 16  }
 0x3f8   : > { %1990 = vsyncadd (%p1644_p6), [#allocation7], 4294967280 }
 0x3f9   : > { %1375 = sfence }
 0x3fa PF: > { %p20_p7 = scmp.ge.s32.totalorder %s2095_s15, 4   ;;  %s2430_s11 = smov %s1997_s12 }
 0x3fb   : > { %s2431_s12 = smov %s2001_s13  ;;  %s2432_s13 = smov %s2105_s18 }
 0x3fc   : > { %s2433_s14 = smov %s2095_s15  ;;  %22 = sbr.rel (!%p20_p7) target bundleno = 8 (0x8), region = 123 }
 0x401   :  { %1381 = vsyncpa [#allocation6], 1 }
 0x402   :  { %1383 = vsyncpa [#allocation6 + $0x1], 1 }
 0x403   :  { %1384 = vsyncpa [#allocation9], 1 }
 0x404   :  { %1385 = vsyncpa [#allocation7], 1 }
 0x405   :  { %1387 = vsyncpa [#allocation7 + $0x1], 1 }

</bundles_post_ra>
